<compile_context>
chip_gen: v6e
topology: v6e:2x2x1
jax: 0.10.0
libtpu: 0.0.40
codegen_flags: <defaults>
</compile_context>

<pallas_src>
import jax
import jax.numpy as jnp
from jax import lax
from jax.experimental import pallas as pl
from jax.experimental.pallas import tpu as pltpu


def _round_up(x: int, m: int) -> int:
    return (x + m - 1) // m * m


def _vmem_capacity_bytes() -> int:
    try:
        return int(pltpu.get_tpu_info().vmem_capacity_bytes)
    except Exception:
        return 64 * 1024 * 1024  # conservative: v7x per-TC VMEM


# ---------------------------------------------------------------------------
# Fast path: table resident in VMEM (single copy), true on-chip row gather.
# ---------------------------------------------------------------------------
def _embed_resident_kernel(ids_ref, table_hbm, out_ref, table_vmem):
    # ids_ref:    (n_pad,) int32 token ids, scalar-prefetched into SMEM
    # table_hbm:  (V, H) embedding table left in HBM (memory_space=pl.ANY)
    # out_ref:    (T, H) lane-dense output tile (pipelined VMEM block)
    # table_vmem: (V, H) persistent VMEM scratch (resident table, 1x copy)
    i = pl.program_id(0)
    T = out_ref.shape[0]

    # Copy the table into VMEM exactly once (grid axis is "arbitrary", so
    # step 0 is guaranteed to run first on the executing core).
    @pl.when(i == 0)
    def _():
        pltpu.sync_copy(table_hbm, table_vmem)

    base = i * T

    def gather_row(t, carry):
        row = ids_ref[base + t]                       # scalar SMEM read
        out_ref[pl.ds(t, 1), :] = table_vmem[pl.ds(row, 1), :]
        return carry

    lax.fori_loop(0, T, gather_row, 0)


# ---------------------------------------------------------------------------
# Fallback (table does not fit VMEM): T row DMAs per tile, single writeback.
# ---------------------------------------------------------------------------
def _embed_dma_gather_kernel(ids_ref, table_hbm, out_ref, rows_vmem, sem):
    # ids_ref:   (n_pad,) int32 ids in SMEM
    # table_hbm: (V, H) table in HBM
    # out_ref:   (T, H) output tile
    # rows_vmem: (T, H) VMEM landing buffer for the gathered rows
    # sem:       single DMA semaphore shared by the T equal-size row copies
    i = pl.program_id(0)
    T = out_ref.shape[0]
    base = i * T

    def issue(t, carry):
        row = ids_ref[base + t]
        pltpu.make_async_copy(
            table_hbm.at[pl.ds(row, 1), :], rows_vmem.at[pl.ds(t, 1), :], sem
        ).start()
        return carry

    lax.fori_loop(0, T, issue, 0)

    def drain(t, carry):
        # All copies are identical (1, H) rows, so waiting T times on the
        # shared semaphore consumes exactly the T completions.
        pltpu.make_async_copy(
            table_hbm.at[pl.ds(0, 1), :], rows_vmem.at[pl.ds(t, 1), :], sem
        ).wait()
        return carry

    lax.fori_loop(0, T, drain, 0)
    out_ref[...] = rows_vmem[...]
    # TODO(synk): double-buffer rows_vmem across tiles (prefetch tile i+1's
    # row DMAs while tile i writes back) and skip DMAs for padded rows.


# ---------------------------------------------------------------------------
# Wrapper
# ---------------------------------------------------------------------------
def text_embedding(token_ids: jax.Array, emb_table: jax.Array,
                   *, max_tile_tokens: int = 512) -> jax.Array:
    """Pallas equivalent of nn.Embedding(vocab_size, hidden_dim)(token_ids)."""
    B, S = token_ids.shape
    V, H = emb_table.shape
    dtype = emb_table.dtype
    itemsize = jnp.dtype(dtype).itemsize

    flat = token_ids.reshape(-1).astype(jnp.int32)
    # NOTE: nn.Embedding would raise on out-of-range ids; we clamp to [0, V).
    flat = jnp.clip(flat, 0, V - 1)
    n_tok = flat.shape[0]

    # Sublane alignment of the output tile (8 rows/vreg for 32-bit, 16 for 16-bit).
    sub = 16 if itemsize == 2 else 8

    vmem_cap = _vmem_capacity_bytes()        # per-TensorCore capacity
    headroom = 6 * 1024 * 1024
    table_bytes = V * H * itemsize

    # Largest token tile that fits next to the single-buffered resident table
    # (output block is double-buffered by the pipeline: 2 * T * H * itemsize).
    def fits(t: int) -> bool:
        return table_bytes + 2 * t * H * itemsize + headroom <= vmem_cap

    candidates = sorted(
        {c for c in (max_tile_tokens, 512, 256, 128, 64, 32, 16, 8)
         if c % sub == 0},
        reverse=True,
    )
    T = None
    for c in candidates:
        if fits(c):
            T = c
            break
    resident = T is not None

    if not resident:
        # DMA-gather fallback: 128 rows per grid step.
        T = _round_up(128, sub)

    # Never tile wider than the (sublane-padded) token count.
    T = max(min(T, _round_up(n_tok, sub)), sub)
    n_pad = _round_up(n_tok, T)
    if n_pad != n_tok:
        flat = jnp.pad(flat, (0, n_pad - n_tok))   # padded ids gather row 0
    grid = (n_pad // T,)
    # TODO(synk): for very large B*S, stream ids per-tile instead of scalar-
    # prefetching the whole id vector into SMEM.

    if resident:
        vmem_limit = table_bytes + 2 * T * H * itemsize + (8 << 20)
        vmem_limit = int(min(vmem_cap, max(16 << 20, vmem_limit)))
        cost = pl.CostEstimate(
            flops=0,
            transcendentals=0,
            bytes_accessed=table_bytes + n_pad * 4 + n_pad * H * itemsize,
        )
        out_flat = pl.pallas_call(
            _embed_resident_kernel,
            out_shape=jax.ShapeDtypeStruct((n_pad, H), dtype),
            grid_spec=pltpu.PrefetchScalarGridSpec(
                num_scalar_prefetch=1,                       # ids -> SMEM
                grid=grid,
                in_specs=[pl.BlockSpec(memory_space=pl.ANY)],  # table in HBM
                out_specs=pl.BlockSpec((T, H), lambda i, ids: (i, 0)),
                scratch_shapes=[pltpu.VMEM((V, H), dtype)],    # resident table
            ),
            compiler_params=pltpu.CompilerParams(
                # "arbitrary": one-shot table load at i == 0 must execute
                # before the other grid steps on the same core.
                dimension_semantics=("arbitrary",),
                vmem_limit_bytes=vmem_limit,
            ),
            cost_estimate=cost,
        )(flat, emb_table)
    else:
        cost = pl.CostEstimate(
            flops=0,
            transcendentals=0,
            bytes_accessed=2 * n_pad * H * itemsize + n_pad * 4,
        )
        out_flat = pl.pallas_call(
            _embed_dma_gather_kernel,
            out_shape=jax.ShapeDtypeStruct((n_pad, H), dtype),
            grid_spec=pltpu.PrefetchScalarGridSpec(
                num_scalar_prefetch=1,
                grid=grid,
                in_specs=[pl.BlockSpec(memory_space=pl.ANY)],
                out_specs=pl.BlockSpec((T, H), lambda i, ids: (i, 0)),
                scratch_shapes=[pltpu.VMEM((T, H), dtype),
                                pltpu.SemaphoreType.DMA(())],
            ),
            compiler_params=pltpu.CompilerParams(
                dimension_semantics=("parallel",),  # tiles independent
            ),
            cost_estimate=cost,
        )(flat, emb_table)

    return out_flat[:n_tok].reshape(B, S, H)


class SupervisedPallas:
    """Mirror of the PyTorch `Supervised` module (embedding only)."""

    def __init__(self, vocab_size: int, hidden_dim: int, key: jax.Array):
        # nn.Embedding default init: N(0, 1)
        self.embedding_table = jax.random.normal(
            key, (vocab_size, hidden_dim), dtype=jnp.float32
        )

    def embed(self, seq: jax.Array) -> jax.Array:
        return text_embedding(seq, self.embedding_table)

    def forward(self, rgb, seq, length):
        # TODO(synk): reference Supervised.forward raises NotImplementedError;
        # only the TextEmbedding lookup (its sole defined compute) is exposed.
        return self.embed(seq)


if __name__ == "__main__":
    VOCAB_SIZE = 32
    HIDDEN_DIM = 128
    B, S = 2, 8

    key = jax.random.PRNGKey(0)
    k_emb, k_ids = jax.random.split(key)

    model = SupervisedPallas(VOCAB_SIZE, HIDDEN_DIM, k_emb)
    seq = jax.random.randint(k_ids, (B, S), 0, VOCAB_SIZE, dtype=jnp.int32)

    out = model.forward(rgb=None, seq=seq, length=None)
    out = jax.block_until_ready(out)

    # sanity check against plain-JAX gather
    ref = jnp.take(model.embedding_table, seq, axis=0)
    assert out.shape == (B, S, HIDDEN_DIM)
    assert jnp.allclose(out, ref), "embedding lookup mismatch"

    print("KERNEL_OK")
</pallas_src>

<mosaic_0001>
module attributes {stable_mosaic.version = 11 : i64} {
  func.func @_embed_resident_kernel(%arg0: i32, %arg1: memref<16xi32, #tpu.memory_space<smem>>, %arg2: memref<32x128xf32, #tpu.memory_space<any>>, %arg3: memref<16x128xf32, #tpu.memory_space<vmem>>, %arg4: memref<32x128xf32, #tpu.memory_space<vmem>>) attributes {dimension_semantics = [#tpu.dimension_semantics<arbitrary>], iteration_bounds = array<i64: 1>, scalar_prefetch = 1 : i64, scratch_operands = 1 : i64, tpu.core_type = #tpu.core_type<tc>, window_params = [{}, {transform_indices = @transform_1, window_bounds = array<i64: 16, 128>}]} {
    %c0_i32 = arith.constant 0 : i32
    %0 = arith.cmpi eq, %arg0, %c0_i32 : i32
    %1 = arith.extui %0 : i1 to i32
    %c0_i32_0 = arith.constant 0 : i32
    %2 = arith.cmpi ne, %1, %c0_i32_0 : i32
    scf.if %2 {
      "tpu.region"() ({
        %5 = tpu.sem_alloc : memref<!tpu.dma_semaphore, #tpu.memory_space<semaphore_mem>>
        tpu.enqueue_dma source(%arg2 : memref<32x128xf32, #tpu.memory_space<any>>) target(%arg4 : memref<32x128xf32, #tpu.memory_space<vmem>>) target_semaphore(%5 : memref<!tpu.dma_semaphore, #tpu.memory_space<semaphore_mem>>)
        tpu.wait_dma2 semaphore(%5 : memref<!tpu.dma_semaphore, #tpu.memory_space<semaphore_mem>>) src(%arg2 : memref<32x128xf32, #tpu.memory_space<any>>) dst(%arg4 : memref<32x128xf32, #tpu.memory_space<vmem>>)
        tpu.yield
      }) : () -> ()
    } else {
    }
    %c16_i32 = arith.constant 16 : i32
    %3 = arith.muli %arg0, %c16_i32 : i32
    %c0_i32_1 = arith.constant 0 : i32
    %c16_i32_2 = arith.constant 16 : i32
    %4 = arith.addi %c0_i32_1, %c16_i32_2 : i32
    %c1_i32 = arith.constant 1 : i32
    scf.for %arg5 = %c0_i32_1 to %4 step %c1_i32  : i32 {
      %5 = arith.addi %3, %arg5 : i32
      %6 = arith.index_cast %5 : i32 to index
      %7 = memref.load %arg1[%6] : memref<16xi32, #tpu.memory_space<smem>>
      %8 = arith.index_cast %7 : i32 to index
      %c0 = arith.constant 0 : index
      %9 = vector.load %arg4[%8, %c0] : memref<32x128xf32, #tpu.memory_space<vmem>>, vector<1x128xf32>
      %10 = arith.index_cast %arg5 : i32 to index
      %c0_4 = arith.constant 0 : index
      %11 = vector.load %arg3[%10, %c0_4] : memref<16x128xf32, #tpu.memory_space<vmem>>, vector<1x128xf32>
      tpu.vector_store %arg3[%10, %c0_4], %9 {strides = array<i32>} : memref<16x128xf32, #tpu.memory_space<vmem>>, vector<1x128xf32>,
    }
    %c16_i32_3 = arith.constant 16 : i32
    return
  }
  func.func @transform_1(%arg0: i32, %arg1: memref<16xi32, #tpu.memory_space<smem>>) -> (i32, i32) {
    %c0_i32 = arith.constant 0 : i32
    %c0_i32_0 = arith.constant 0 : i32
    return %arg0, %c0_i32 : i32, i32
  }
}

</mosaic_0001>

<bundles_post_ra>
// kernel: tpu_custom_call.1
= control target key start
LH: loop header
LB: loop body
LE: loop exit
PB: predicated region body
PF: predicated region fallthrough
CT: control target
= control target key end

     0   :  { %s141_s9 = smov [#allocation4]   ;;  %s170_s0 = inlined_call_operand.hbm [shape: s32[16], index: 0, kind: input, shape index: {}]   ;;  %s171_s1 = inlined_call_operand.hbm [shape: f32[32,128], index: 1, kind: input, shape index: {}]   ;;  %s172_s2 = inlined_call_operand.hbm [shape: f32[16,128], index: 2, kind: output, shape index: {}]  }
   0x1   :  { %8 = dma.hbm_to_smem %s170_s0, 16, %s141_s9, [#allocation3] }
   0x2   :  { %131 = dma.done.wait [#allocation3], 16 }
   0x3   :  { %132 = vsyncadd [#allocation3], 4294967280 }
   0x4   :  { %10 = sfence }
   0x5   :  { %11 = vsyncpa [#allocation6], 0 }
   0x6   :  { %s142_s12 = smov [#allocation2]  }
   0x7   :  { %s23_s13 = sshll.u32 %s142_s12, 4  ;;  %s24_s13 = int_to_ptr.vmem [resolvable:$true] %s23_s13 }
   0x8   :  { %s95_s14 = scalar_lea.vmem %s24_s13, 512  ;;  %p100_p1 = scmp.lt.s32.totalorder %s24_s13, %s24_s13 }
   0x9   :  { %p96_p0 = scmp.ne.s32.totalorder %s24_s13, %s95_s14  ;;  %p101_p2 = scmp.lt.s32.totalorder %s95_s14, %s95_s14 }
   0xb   :  { %p102_p3 = por %p101_p2, %p100_p1 }
   0xd   :  { %p103_p4 = pnand %p102_p3, %p96_p0 }
   0xf   :  { %106 = shalt.err (!%p103_p4)  }
  0x10   :  { %26 = dma.hbm_to_vmem [thread:$0]  %s171_s1, 512, %s24_s13, [#allocation7] }
  0x11   :  { %133 = dma.done.wait [#allocation7], 512 }
  0x12   :  { %134 = vsyncadd [#allocation7], 4294966784  ;;  %s137_s0 = smov 0  }
  0x13 LB: > { %s38_s17 = sld [smem:[#allocation4 + %s139_s0]]  ;;  %s41_s19 = scalar_lea.vmem [#allocation5], %s139_s0  ;;  %s139_s0 = sphi %s137_s0, %s36_s0  }
  0x14   : > { %s36_s0 = sadd.s32 1, %s139_s0  }
  0x15   : > { %p33_p5 = scmp.ge.s32.totalorder %s36_s0, 16  }
  0x16   :  { %s143_s20 = smov (%p33_p5), [#allocation5]  }
  0x17   :  { %35 = sbr.rel (!%p33_p5) target bundleno = 19 (0x13), region = 38  ;;  %s48_s21 = sshll.u32 (%p33_p5), %s143_s20, 4  ;;  %s49_s21 = int_to_ptr.vmem [resolvable:$true] %s48_s21 }
  0x18   :  { %s107_s22 = scalar_lea.vmem (%p33_p5), %s49_s21, 256  ;;  %p112_p7 = scmp.lt.s32.totalorder (%p33_p5), %s49_s21, %s49_s21 }
  0x19   : > { %s39_s18 = scalar_lea.vmem [#allocation2], %s38_s17  ;;  %p108_p6 = scmp.ne.s32.totalorder (%p33_p5), %s49_s21, %s107_s22 }
  0x1a   : > { %v40_v0 = vld [vmem:[%s39_s18] sm:$0x1]  ;;  %p113_p8 = scmp.lt.s32.totalorder (%p33_p5), %s107_s22, %s107_s22 }
  0x1b   : > { %42 = vst [vmem:[%s41_s19] sm:$0x1] %v40_v0 }
  0x1c   :  { %p114_p9 = por %p113_p8, %p112_p7 }
  0x1e   :  { %p115_p10 = pnand %p114_p9, %p108_p6 }
  0x20   :  { %118 = shalt.err (!%p115_p10)
}
  0x21   :  { %s144_s1 = smov 128   ;;  %s145_s23 = smov 8  }
  0x22   :  { %54 = dma.vmem_to_hbm [thread:$0]  %s49_s21, 256, %s172_s2, [#allocation6], %s144_s1, %s144_s1, %s145_s23  }
  0x23   :  { %135 = dma.done.wait [#allocation6], 256  }
  0x24   :  { %136 = vsyncadd [#allocation6], 4294967040 }
  0x25   :  { %58 = vsyncpa [#allocation6], 1 }

</bundles_post_ra>
